<compile_context>
chip_gen: v5e
topology: v5e:2x2
jax: 0.10.0
libtpu: 0.0.40
codegen_flags: <defaults>
</compile_context>

<pallas_src>
import math

import jax
import jax.numpy as jnp
import numpy as np
from jax.experimental import pallas as pl
from jax.experimental.pallas import tpu as pltpu


# ----------------------------------------------------------------------------
# Fused attention kernel
# ----------------------------------------------------------------------------
def make_attention_kernel(*, dim_head, seq, tb):
    M = tb * seq

    def kernel(x_ref, wqkv_ref, wo_ref, bo_ref, o_ref, xb_ref):
        # x_ref:    (M, D)              f32   (same block for every head step)
        # wqkv_ref: (3, D, dim_head)    bf16  rows = [q_h, k_h, v_h], scale in q
        # wo_ref:   (1, dim_head, D)    bf16  this head's rows of Wo
        # bo_ref:   (1, D)              f32
        # o_ref:    (M, D)              f32   resident accumulator across heads
        # xb_ref:   (M, D)              bf16  VMEM scratch (cast once per block)
        h = pl.program_id(1)

        # Cast the activation block to bf16 once per batch block, reuse per head.
        @pl.when(h == 0)
        def _():
            xb_ref[...] = x_ref[...].astype(jnp.bfloat16)

        xb = xb_ref[...]                                             # (M, D) bf16

        # Per-head projections (leading-dim weight indexing; no lane slicing).
        q = jnp.dot(xb, wqkv_ref[0], preferred_element_type=jnp.float32)
        k = jnp.dot(xb, wqkv_ref[1], preferred_element_type=jnp.float32)
        v = jnp.dot(xb, wqkv_ref[2], preferred_element_type=jnp.float32)

        q3 = q.reshape(tb, seq, dim_head).astype(jnp.bfloat16)
        k3 = k.reshape(tb, seq, dim_head).astype(jnp.bfloat16)
        v3 = v.reshape(tb, seq, dim_head).astype(jnp.bfloat16)

        # Batched attention over the tb samples in this block.
        dots = jnp.einsum('bnd,bmd->bnm', q3, k3,
                          preferred_element_type=jnp.float32)        # (tb, N, N)
        m = jnp.max(dots, axis=-1, keepdims=True)
        e = jnp.exp(dots - m)
        p = e * pl.reciprocal(jnp.sum(e, axis=-1, keepdims=True), approx=True)
        ctx = jnp.einsum('bnm,bmd->bnd', p.astype(jnp.bfloat16), v3,
                         preferred_element_type=jnp.float32)         # (tb, N, dh)
        ctx2d = ctx.reshape(M, dim_head).astype(jnp.bfloat16)

        # This head's contribution to the output projection.
        contrib = jnp.dot(ctx2d, wo_ref[0],
                          preferred_element_type=jnp.float32)        # (M, D)

        @pl.when(h == 0)
        def _():
            o_ref[...] = jnp.broadcast_to(bo_ref[...], o_ref.shape)

        o_ref[...] += contrib

    return kernel


def _pick_block_b(B, N, D, *, target_bytes=2 << 20):
    """Batch block size: ~1-2 MiB f32 activation blocks, divisor of B, and
    >= 2 steps on the parallel grid axis whenever possible (v7x megacore)."""
    tb = max(1, min(B, target_bytes // (N * D * 4)))
    if B >= 2:
        tb = max(1, min(tb, B // 2))
    while B % tb:
        tb -= 1
    return tb


def attention_forward(x, wqkv_t, wo_t, bo, *, heads, dim_head, block_b=None):
    """x: (B, N, dim). wqkv_t: (dim, 3*heads*dim_head). wo_t: (inner, dim) or
    None (project_out == False). bo: (dim,) or None. Returns (B, N, dim) f32."""
    B, N, D = x.shape
    inner = heads * dim_head
    scale = dim_head ** (-0.5)

    if wo_t is None:   # project_out == False  (heads == 1 and dim_head == dim)
        wo_t = jnp.eye(inner, D, dtype=jnp.float32)
        bo = jnp.zeros((D,), jnp.float32)

    # --- weight re-layout: head-major, leading-dim indexable; fold softmax
    #     scale into the q columns (exact: to_qkv has no bias).
    w4 = wqkv_t.reshape(D, 3, heads, dim_head)
    w4 = w4 * jnp.array([scale, 1.0, 1.0], wqkv_t.dtype)[None, :, None, None]
    wqkv_heads = (jnp.transpose(w4, (2, 1, 0, 3))             # (H, 3, D, dh)
                  .reshape(heads * 3, D, dim_head)
                  .astype(jnp.bfloat16))
    wo_heads = wo_t.reshape(heads, dim_head, D).astype(jnp.bfloat16)
    bo_f = bo.reshape(1, D).astype(jnp.float32)

    # --- batch tiling
    tb = _pick_block_b(B, N, D) if block_b is None else block_b
    assert B % tb == 0 and N % 8 == 0, "batch block / sequence alignment"
    M = tb * N

    x2d = x.reshape(B * N, D)   # metadata-only reshape; cast happens in-kernel

    kernel = make_attention_kernel(dim_head=dim_head, seq=N, tb=tb)
    out2d = pl.pallas_call(
        kernel,
        out_shape=jax.ShapeDtypeStruct((B * N, D), jnp.float32),
        grid=(B // tb, heads),
        in_specs=[
            pl.BlockSpec((M, D), lambda i, h: (i, 0)),            # x (per block i)
            pl.BlockSpec((3, D, dim_head), lambda i, h: (h, 0, 0)),   # [q,k,v]_h
            pl.BlockSpec((1, dim_head, D), lambda i, h: (h, 0, 0)),   # Wo rows of h
            pl.BlockSpec((1, D), lambda i, h: (0, 0)),            # bias
        ],
        out_specs=pl.BlockSpec((M, D), lambda i, h: (i, 0)),      # resident acc
        scratch_shapes=[pltpu.VMEM((M, D), jnp.bfloat16)],        # bf16 x cache
        compiler_params=pltpu.CompilerParams(
            dimension_semantics=("parallel", "arbitrary"),
            vmem_limit_bytes=64 * 1024 * 1024),
    )(x2d, wqkv_heads, wo_heads, bo_f)
    return out2d.reshape(B, N, D)


# ----------------------------------------------------------------------------
# Pure-JAX reference (mirrors the PyTorch forward) + deterministic params
# ----------------------------------------------------------------------------
def reference_forward(x, wqkv_t, wo_t, bo, *, heads, dim_head):
    B, N, D = x.shape
    inner = heads * dim_head
    scale = dim_head ** (-0.5)
    qkv = x @ wqkv_t                                       # (B, N, 3*inner)
    q, k, v = jnp.split(qkv, 3, axis=-1)

    def split_heads(t):                                    # 'b n (h d) -> b h n d'
        return t.reshape(B, N, heads, dim_head).transpose(0, 2, 1, 3)

    q, k, v = map(split_heads, (q, k, v))
    dots = jnp.einsum('bhnd,bhmd->bhnm', q, k) * scale
    attn = jax.nn.softmax(dots, axis=-1)
    out = jnp.einsum('bhnm,bhmd->bhnd', attn, v)
    out = out.transpose(0, 2, 1, 3).reshape(B, N, inner)   # 'b h n d -> b n (h d)'
    if wo_t is None:
        return out
    return out @ wo_t + bo


def init_params(key, dim, heads, dim_head):
    inner = heads * dim_head
    k1, k2, k3 = jax.random.split(key, 3)

    def unif(k, shape, fan_in):                            # nn.Linear-style init
        bound = 1.0 / math.sqrt(fan_in)
        return jax.random.uniform(k, shape, jnp.float32, -bound, bound)

    wqkv_t = unif(k1, (dim, 3 * inner), dim)               # to_qkv (bias=False)
    project_out = not (heads == 1 and dim_head == dim)
    if project_out:
        wo_t = unif(k2, (inner, dim), inner)               # to_out Linear weight^T
        bo = unif(k3, (dim,), inner)                       # to_out Linear bias
    else:
        wo_t, bo = None, None
    return wqkv_t, wo_t, bo


if __name__ == "__main__":
    B, N, dim = 2, 16, 128
    heads, dim_head = 4, 32          # inner_dim = 128, project_out = True

    key = jax.random.PRNGKey(0)
    kx, kp = jax.random.split(key)
    x = jax.random.normal(kx, (B, N, dim), dtype=jnp.float32)
    wqkv_t, wo_t, bo = init_params(kp, dim, heads, dim_head)

    out = attention_forward(x, wqkv_t, wo_t, bo, heads=heads, dim_head=dim_head)
    out = jax.block_until_ready(out)

    ref = reference_forward(x, wqkv_t, wo_t, bo, heads=heads, dim_head=dim_head)
    np.testing.assert_allclose(np.asarray(out), np.asarray(ref),
                               rtol=2e-2, atol=2e-2)
    print("KERNEL_OK")
</pallas_src>

<mosaic_0001>
module attributes {stable_mosaic.version = 11 : i64} {
  func.func @kernel(%arg0: i32, %arg1: i32, %arg2: memref<16x128xf32, #tpu.memory_space<vmem>>, %arg3: memref<3x128x32xbf16, #tpu.memory_space<vmem>>, %arg4: memref<1x32x128xbf16, #tpu.memory_space<vmem>>, %arg5: memref<1x128xf32, #tpu.memory_space<vmem>>, %arg6: memref<16x128xf32, #tpu.memory_space<vmem>>, %arg7: memref<16x128xbf16, #tpu.memory_space<vmem>>) attributes {dimension_semantics = [#tpu.dimension_semantics<parallel>, #tpu.dimension_semantics<arbitrary>], iteration_bounds = array<i64: 2, 4>, scalar_prefetch = 0 : i64, scratch_operands = 1 : i64, tpu.core_type = #tpu.core_type<tc>, window_params = [{transform_indices = @transform_0, window_bounds = array<i64: 16, 128>}, {transform_indices = @transform_1, window_bounds = array<i64: 3, 128, 32>}, {transform_indices = @transform_2, window_bounds = array<i64: 1, 32, 128>}, {pipeline_mode = #tpu.pipeline_mode<synchronous>, transform_indices = @transform_3, window_bounds = array<i64: 1, 128>}, {transform_indices = @transform_4, window_bounds = array<i64: 16, 128>}]} {
    %c0_i32 = arith.constant 0 : i32
    %0 = arith.cmpi eq, %arg1, %c0_i32 : i32
    %1 = arith.extui %0 : i1 to i32
    %c0_i32_0 = arith.constant 0 : i32
    %2 = arith.cmpi ne, %1, %c0_i32_0 : i32
    scf.if %2 {
      %c0_25 = arith.constant 0 : index
      %c0_26 = arith.constant 0 : index
      %43 = vector.load %arg2[%c0_25, %c0_26] : memref<16x128xf32, #tpu.memory_space<vmem>>, vector<16x128xf32>
      %44 = arith.truncf %43 : vector<16x128xf32> to vector<16x128xbf16>
      %c0_27 = arith.constant 0 : index
      %c0_28 = arith.constant 0 : index
      %45 = vector.load %arg7[%c0_27, %c0_28] : memref<16x128xbf16, #tpu.memory_space<vmem>>, vector<16x128xbf16>
      tpu.vector_store %arg7[%c0_27, %c0_28], %44 {strides = array<i32>} : memref<16x128xbf16, #tpu.memory_space<vmem>>, vector<16x128xbf16>,
    } else {
    }
    %c0 = arith.constant 0 : index
    %c0_1 = arith.constant 0 : index
    %3 = vector.load %arg7[%c0, %c0_1] : memref<16x128xbf16, #tpu.memory_space<vmem>>, vector<16x128xbf16>
    %c0_2 = arith.constant 0 : index
    %c0_3 = arith.constant 0 : index
    %c0_4 = arith.constant 0 : index
    %4 = vector.load %arg3[%c0_2, %c0_3, %c0_4] : memref<3x128x32xbf16, #tpu.memory_space<vmem>>, vector<1x128x32xbf16>
    %5 = vector.shape_cast %4 : vector<1x128x32xbf16> to vector<128x32xbf16>
    %cst = arith.constant dense<0.000000e+00> : vector<16x32xf32>
    %6 = tpu.matmul %3, %5, %cst {dimension_numbers = #tpu.dot_dimension_numbers<[1], [0], [0], [1], [0, 0, 1, 1], [], []>} : vector<16x128xbf16>, vector<128x32xbf16>, vector<16x32xf32> -> vector<16x32xf32>
    %c1 = arith.constant 1 : index
    %c0_5 = arith.constant 0 : index
    %c0_6 = arith.constant 0 : index
    %7 = vector.load %arg3[%c1, %c0_5, %c0_6] : memref<3x128x32xbf16, #tpu.memory_space<vmem>>, vector<1x128x32xbf16>
    %8 = vector.shape_cast %7 : vector<1x128x32xbf16> to vector<128x32xbf16>
    %cst_7 = arith.constant dense<0.000000e+00> : vector<16x32xf32>
    %9 = tpu.matmul %3, %8, %cst_7 {dimension_numbers = #tpu.dot_dimension_numbers<[1], [0], [0], [1], [0, 0, 1, 1], [], []>} : vector<16x128xbf16>, vector<128x32xbf16>, vector<16x32xf32> -> vector<16x32xf32>
    %c2 = arith.constant 2 : index
    %c0_8 = arith.constant 0 : index
    %c0_9 = arith.constant 0 : index
    %10 = vector.load %arg3[%c2, %c0_8, %c0_9] : memref<3x128x32xbf16, #tpu.memory_space<vmem>>, vector<1x128x32xbf16>
    %11 = vector.shape_cast %10 : vector<1x128x32xbf16> to vector<128x32xbf16>
    %cst_10 = arith.constant dense<0.000000e+00> : vector<16x32xf32>
    %12 = tpu.matmul %3, %11, %cst_10 {dimension_numbers = #tpu.dot_dimension_numbers<[1], [0], [0], [1], [0, 0, 1, 1], [], []>} : vector<16x128xbf16>, vector<128x32xbf16>, vector<16x32xf32> -> vector<16x32xf32>
    %13 = vector.shape_cast %6 : vector<16x32xf32> to vector<1x16x32xf32>
    %14 = arith.truncf %13 : vector<1x16x32xf32> to vector<1x16x32xbf16>
    %15 = vector.shape_cast %9 : vector<16x32xf32> to vector<1x16x32xf32>
    %16 = arith.truncf %15 : vector<1x16x32xf32> to vector<1x16x32xbf16>
    %17 = vector.shape_cast %12 : vector<16x32xf32> to vector<1x16x32xf32>
    %18 = arith.truncf %17 : vector<1x16x32xf32> to vector<1x16x32xbf16>
    "tpu.trace_start"() <{level = 10 : i32, message = "bnd,bmd->bnm"}> : () -> ()
    %cst_11 = arith.constant dense<0.000000e+00> : vector<1x16x16xf32>
    %19 = tpu.matmul %14, %16, %cst_11 {dimension_numbers = #tpu.dot_dimension_numbers<[2], [2], [1], [1], [0, 0, 0, 1, 1, 1], [0], [0]>} : vector<1x16x32xbf16>, vector<1x16x32xbf16>, vector<1x16x16xf32> -> vector<1x16x16xf32>
    "tpu.trace_stop"() : () -> ()
    %cst_12 = arith.constant dense<0xFF800000> : vector<1x16xf32>
    %20 = vector.multi_reduction <maximumf>, %19, %cst_12 [2] : vector<1x16x16xf32> to vector<1x16xf32>
    %21 = vector.shape_cast %20 : vector<1x16xf32> to vector<1x16x1xf32>
    %22 = vector.broadcast %21 : vector<1x16x1xf32> to vector<1x16x16xf32>
    %23 = arith.subf %19, %22 : vector<1x16x16xf32>
    %24 = math.exp %23 : vector<1x16x16xf32>
    %cst_13 = arith.constant dense<0.000000e+00> : vector<1x16xf32>
    %25 = vector.multi_reduction <add>, %24, %cst_13 [2] : vector<1x16x16xf32> to vector<1x16xf32>
    %26 = vector.shape_cast %25 : vector<1x16xf32> to vector<1x16x1xf32>
    %27 = tpu.reciprocal %26 {approx = true} : vector<1x16x1xf32> -> vector<1x16x1xf32>
    %28 = vector.broadcast %27 : vector<1x16x1xf32> to vector<1x16x16xf32>
    %29 = arith.mulf %24, %28 : vector<1x16x16xf32>
    %30 = arith.truncf %29 : vector<1x16x16xf32> to vector<1x16x16xbf16>
    "tpu.trace_start"() <{level = 10 : i32, message = "bnm,bmd->bnd"}> : () -> ()
    %cst_14 = arith.constant dense<0.000000e+00> : vector<1x16x32xf32>
    %31 = tpu.matmul %30, %18, %cst_14 {dimension_numbers = #tpu.dot_dimension_numbers<[2], [1], [1], [2], [0, 0, 0, 1, 1, 2], [0], [0]>} : vector<1x16x16xbf16>, vector<1x16x32xbf16>, vector<1x16x32xf32> -> vector<1x16x32xf32>
    "tpu.trace_stop"() : () -> ()
    %32 = vector.shape_cast %31 : vector<1x16x32xf32> to vector<16x32xf32>
    %33 = arith.truncf %32 : vector<16x32xf32> to vector<16x32xbf16>
    %c0_15 = arith.constant 0 : index
    %c0_16 = arith.constant 0 : index
    %c0_17 = arith.constant 0 : index
    %34 = vector.load %arg4[%c0_15, %c0_16, %c0_17] : memref<1x32x128xbf16, #tpu.memory_space<vmem>>, vector<1x32x128xbf16>
    %35 = vector.shape_cast %34 : vector<1x32x128xbf16> to vector<32x128xbf16>
    %cst_18 = arith.constant dense<0.000000e+00> : vector<16x128xf32>
    %36 = tpu.matmul %33, %35, %cst_18 {dimension_numbers = #tpu.dot_dimension_numbers<[1], [0], [0], [1], [0, 0, 1, 1], [], []>} : vector<16x32xbf16>, vector<32x128xbf16>, vector<16x128xf32> -> vector<16x128xf32>
    %c0_i32_19 = arith.constant 0 : i32
    %37 = arith.cmpi eq, %arg1, %c0_i32_19 : i32
    %38 = arith.extui %37 : i1 to i32
    %c0_i32_20 = arith.constant 0 : i32
    %39 = arith.cmpi ne, %38, %c0_i32_20 : i32
    scf.if %39 {
      %c0_25 = arith.constant 0 : index
      %c0_26 = arith.constant 0 : index
      %43 = vector.load %arg5[%c0_25, %c0_26] : memref<1x128xf32, #tpu.memory_space<vmem>>, vector<1x128xf32>
      %44 = vector.shape_cast %43 : vector<1x128xf32> to vector<1x128xf32>
      %45 = vector.broadcast %44 : vector<1x128xf32> to vector<16x128xf32>
      %c0_27 = arith.constant 0 : index
      %c0_28 = arith.constant 0 : index
      %46 = vector.load %arg6[%c0_27, %c0_28] : memref<16x128xf32, #tpu.memory_space<vmem>>, vector<16x128xf32>
      tpu.vector_store %arg6[%c0_27, %c0_28], %45 {strides = array<i32>} : memref<16x128xf32, #tpu.memory_space<vmem>>, vector<16x128xf32>,
    } else {
    }
    %c0_21 = arith.constant 0 : index
    %c0_22 = arith.constant 0 : index
    %40 = vector.load %arg6[%c0_21, %c0_22] : memref<16x128xf32, #tpu.memory_space<vmem>>, vector<16x128xf32>
    %41 = arith.addf %40, %36 : vector<16x128xf32>
    %c0_23 = arith.constant 0 : index
    %c0_24 = arith.constant 0 : index
    %42 = vector.load %arg6[%c0_23, %c0_24] : memref<16x128xf32, #tpu.memory_space<vmem>>, vector<16x128xf32>
    tpu.vector_store %arg6[%c0_23, %c0_24], %41 {strides = array<i32>} : memref<16x128xf32, #tpu.memory_space<vmem>>, vector<16x128xf32>,
    return
  }
  func.func @transform_0(%arg0: i32, %arg1: i32) -> (i32, i32) {
    %c0_i32 = arith.constant 0 : i32
    %c0_i32_0 = arith.constant 0 : i32
    return %arg0, %c0_i32 : i32, i32
  }
  func.func @transform_1(%arg0: i32, %arg1: i32) -> (i32, i32, i32) {
    %c0_i32 = arith.constant 0 : i32
    %c0_i32_0 = arith.constant 0 : i32
    %c0_i32_1 = arith.constant 0 : i32
    return %arg1, %c0_i32, %c0_i32_0 : i32, i32, i32
  }
  func.func @transform_2(%arg0: i32, %arg1: i32) -> (i32, i32, i32) {
    %c0_i32 = arith.constant 0 : i32
    %c0_i32_0 = arith.constant 0 : i32
    %c0_i32_1 = arith.constant 0 : i32
    return %arg1, %c0_i32, %c0_i32_0 : i32, i32, i32
  }
  func.func @transform_3(%arg0: i32, %arg1: i32) -> (i32, i32) {
    %c0_i32 = arith.constant 0 : i32
    %c0_i32_0 = arith.constant 0 : i32
    %c0_i32_1 = arith.constant 0 : i32
    return %c0_i32, %c0_i32_0 : i32, i32
  }
  func.func @transform_4(%arg0: i32, %arg1: i32) -> (i32, i32) {
    %c0_i32 = arith.constant 0 : i32
    %c0_i32_0 = arith.constant 0 : i32
    return %arg0, %c0_i32 : i32, i32
  }
}

</mosaic_0001>

<bundles_post_ra>
// kernel: tpu_custom_call.1
= control target key start
LH: loop header
LB: loop body
LE: loop exit
PB: predicated region body
PF: predicated region fallthrough
CT: control target
= control target key end

     0   :  { %9 = vsyncpa [#allocation4], 0  ;;  %s1349_s0 = inlined_call_operand.vmem [shape: f32[32,128], index: 0, kind: input, shape index: {}]   ;;  %s1350_s1 = inlined_call_operand.vmem [shape: bf16[12,128,32], index: 1, kind: input, shape index: {}]   ;;  %s1351_s2 = inlined_call_operand.vmem [shape: bf16[4,32,128], index: 2, kind: input, shape index: {}]   ;;  %s1352_s3 = inlined_call_operand.vmem [shape: f32[1,128], index: 3, kind: input, shape index: {}]   ;;  %s1353_s4 = inlined_call_operand.hbm [shape: f32[32,128], index: 4, kind: output, shape index: {}]  }
   0x1   :  { %11 = vsyncpa [#allocation4 + $0x1], 0  ;;  %s1165_s15 = smov 0   ;;  %s1167_s16 = smov 0  }
   0x2   :  { %s1169_s17 = smov 0   ;;  %s1171_s18 = smov 0  }
   0x3   :  { %s1173_s19 = smov 0   ;;  %s1175_s20 = smov 0  }
   0x4   :  { %s1177_s21 = smov 0   ;;  %s1179_s22 = smov 0  }
   0x5 LB: > { %1358 = sst [smem:[#allocation6_spill]] %s1128_s20  ;;  %s763_s23 = sadd.s32 4294967295, %s1136_s22   ;;  %s1136_s22 = sphi %s1179_s22, %s17_s22   ;;  %s1132_s21 = sphi %s1177_s21, %s1368_s21   ;;  %s1128_s20 = sphi %s1175_s20, %s1367_s20   ;;  %s1124_s19 = sphi %s1173_s19, %s1366_s19   ;;  %s1120_s18 = sphi %s1171_s18, %s1365_s18   ;;  %s1116_s17 = sphi %s1169_s17, %s1371_s17   ;;  %s1112_s16 = sphi %s1167_s16, %s1370_s16   ;;  %s1108_s15 = sphi %s1165_s15, %s1369_s15  }
   0x6   : > { %1359 = sst [smem:[#allocation7_spill]] %s1132_s21  ;;  %s764_s24 = sadd.s32 4294967294, %s1136_s22  }
   0x7   : > { %s26_s25 = sadd.s32 1, %s1128_s20  ;;  %s29_s26 = sadd.s32 1, %s1132_s21 }
   0x8   : > { %p27_p0 = scmp.ge.s32.totalorder %s26_s25, 4  ;;  %p145_p1 = scmp.ne.s32.totalorder %s1116_s17, %s1112_s16 }
   0x9   : > { %p146_p2 = scmp.eq.s32.totalorder %s763_s23, 7  ;;  %p151_p4 = scmp.ne.s32.totalorder %s1112_s16, %s1108_s15 }
   0xa   : > { %s1373_s25 = smov (%p27_p0, %s26_s25), 0  ;;  %s1375_s26 = smov (!%p27_p0, %s29_s26), %s1132_s21 }
   0xb   : > { %1360 = sst [smem:[#allocation8_spill]] %s1373_s25  ;;  %p1214_p3 = por %p146_p2, %p145_p1 }
   0xc   : > { %p31_p5 = scmp.ge.s32.totalorder %s1375_s26, 2  ;;  %p152_p6 = scmp.eq.s32.totalorder %s764_s24, 7 }
   0xd   : > { %p767_p7 = scmp.ge.s32.totalorder %s1136_s22, 1  ;;  %p200_p8 = scmp.lt.s32.totalorder %s1136_s22, 9 }
   0xe   : > { %s1377_s26 = smov (%p31_p5, %s1375_s26), 0  ;;  %p1224_p9 = por %p152_p6, %p151_p4 }
   0xf   : > { %1362 = sst [smem:[#allocation9_spill]] %s1377_s26  ;;  %p201_p10 = pnand %p767_p7, %p200_p8 }
  0x10   : > { %s132_s29 = ssub.s32 %s1132_s21, %s1377_s26  ;;  %s135_s30 = sadd.s32 1, %s1116_s17 }
  0x11   : > { %p133_p11 = scmp.eq.s32.totalorder %s132_s29, 0  ;;  %204 = sbr.rel (%p201_p10) target bundleno = 918 (0x396), region = 36 }
  0x12   : > { %s1355_s6 = sand.u32 (!%p201_p10), 1, %s1112_s16   ;;  %s769_s7 = sshll.u32 (!%p201_p10), %s1124_s19, 1 }
  0x13   : > { %s1232_s5 = scalar_select %p133_p11, %s1116_s17, %s135_s30  }
  0x14   : > { %s768_s8 = sshll.u32 (!%p201_p10), %s1355_s6, 4  ;;  %p238_p12 = scmp.lt.s32.totalorder (!%p201_p10), %s769_s7, 3 }
  0x15   : > { %s243_s9 = smul.u32 (!%p201_p10), 3, %s1120_s18  ;;  %p250_p0 = scmp.lt.s32.totalorder (!%p201_p10), %s1120_s18, 3 }
  0x16   : > { %s1379_s7 = smov (!%p238_p12, %s769_s7), 3  ;;  %s1254_s20 = scalar_lea.vmem [#allocation3], %s768_s8 }
  0x17   : > { %p244_p13 = scmp.lt.s32.totalorder %s243_s9, 11  ;;  %s770_s10 = sshll.u32 %s1379_s7, 3 }
  0x18   : > { %s241_s13 = scalar_lea.vmem %s1349_s0, %s770_s10  ;;  %p775_p1 = scmp.ne.s32.totalorder %s1120_s18, 0 }
  0x19   : > { %s1381_s9 = smov (!%p244_p13, %s243_s9), 11 }
  0x1a   : > { %s251_s14 = scalar_select %p250_p0, %s1120_s18, 3 }
  0x1b   : > { %s925_s23 = sshll.u32 %s1381_s9, 6  ;;  %260 = sbr.rel (%p775_p1) target bundleno = 36 (0x24), region = 40 }
  0x1c   : > { %s1247_s30 = scalar_lea.vmem %s1350_s1, %s925_s23  ;;  %s926_s26 = sshll.u32 %s251_s14, 4 }
  0x1d   : > { %s1252_s21 = scalar_lea.vmem %s1351_s2, %s926_s26 }
  0x20   : > { %v261_v0 = vld [vmem:[%s241_s13] sm:$0xff]  ;;  %v262_v1 = vld [vmem:[%s241_s13 + $0x8] sm:$0xff] }
  0x21   : > { %v958_v2 = vpack.c.bf16 %v262_v1, %v261_v0 }
  0x23   : > { %959 = vst [vmem:[#allocation2] sm:$0xff] %v958_v2  }
  0x24 PF: > { %v935_v3 = vld [vmem:[%s1247_s30 + $0x38] sm:$0xff]  ;;  %v934_v5 = vld [vmem:[%s1247_s30 + $0x30] sm:$0xff]  ;;  %v933_v7 = vld [vmem:[%s1247_s30 + $0x28] sm:$0xff]  ;;  %vm527_vm0 = vcmask 261120   ;;  %vm548_vm1 = vcmask 130048  }
  0x25   : > { %v943_v4 = vld [vmem:[%s1247_s30 + $0x78] sm:$0xff]  ;;  %339 = vmatpush.bf16.msra.mxu0 %v935_v3  ;;  %v942_v6 = vld [vmem:[%s1247_s30 + $0x70] sm:$0xff]  ;;  %v941_v8 = vld [vmem:[%s1247_s30 + $0x68] sm:$0xff] }
  0x26   : > { %418 = vmatpush.bf16.msra.mxu1 %v943_v4  ;;  %v932_v9 = vld [vmem:[%s1247_s30 + $0x20] sm:$0xff]  ;;  %v931_v11 = vld [vmem:[%s1247_s30 + $0x18] sm:$0xff]  ;;  %v930_v13 = vld [vmem:[%s1247_s30 + $0x10] sm:$0xff] }
  0x27   : > { %v940_v10 = vld [vmem:[%s1247_s30 + $0x60] sm:$0xff]  ;;  %v939_v12 = vld [vmem:[%s1247_s30 + $0x58] sm:$0xff]  ;;  %v938_v14 = vld [vmem:[%s1247_s30 + $0x50] sm:$0xff] }
  0x28   : > { %v929_v15 = vld [vmem:[%s1247_s30 + $0x8] sm:$0xff]  ;;  %v928_v17 = vld [vmem:[%s1247_s30] sm:$0xff]  ;;  %v951_v35 = vld [vmem:[%s1247_s30 + $0xb8] sm:$0xff] }
  0x29   : > { %340 = vmatpush.bf16.msra.mxu0 %v934_v5  ;;  %v937_v16 = vld [vmem:[%s1247_s30 + $0x48] sm:$0xff]  ;;  %v936_v18 = vld [vmem:[%s1247_s30 + $0x40] sm:$0xff]  ;;  %497 = vmatpush.bf16.msra.mxu2 %v951_v35  ;;  %v950_v36 = vld [vmem:[%s1247_s30 + $0xb0] sm:$0xff] }
  0x2a   : > { %419 = vmatpush.bf16.msra.mxu1 %v942_v6  ;;  %v927_v19 = vld [vmem:[#allocation2] sm:$0xff]  ;;  %v949_v37 = vld [vmem:[%s1247_s30 + $0xa8] sm:$0xff]  ;;  %v947_v39 = vld [vmem:[%s1247_s30 + $0x98] sm:$0xff] }
  0x2b   : > { %v948_v38 = vld [vmem:[%s1247_s30 + $0xa0] sm:$0xff]  ;;  %v946_v40 = vld [vmem:[%s1247_s30 + $0x90] sm:$0xff]  ;;  %v945_v42 = vld [vmem:[%s1247_s30 + $0x88] sm:$0xff] }
  0x2c   : > { %v944_v44 = vld [vmem:[%s1247_s30 + $0x80] sm:$0xff]  ;;  %v953_v0 = vld [vmem:[%s1252_s21 + $0x8] sm:$0xff] }
  0x2d   : > { %341 = vmatpush.bf16.msra.mxu0 %v933_v7  ;;  %498 = vmatpush.bf16.msra.mxu2 %v950_v36 }
  0x2e   : > { %420 = vmatpush.bf16.msra.mxu1 %v941_v8 }
  0x31   : > { %342 = vmatpush.bf16.msra.mxu0 %v932_v9  ;;  %499 = vmatpush.bf16.msra.mxu2 %v949_v37 }
  0x32   : > { %421 = vmatpush.bf16.msra.mxu1 %v940_v10 }
  0x35   : > { %343 = vmatpush.bf16.msra.mxu0 %v931_v11  ;;  %500 = vmatpush.bf16.msra.mxu2 %v948_v38 }
  0x36   : > { %422 = vmatpush.bf16.msra.mxu1 %v939_v12  ;;  %v952_v12 = vld [vmem:[%s1252_s21] sm:$0xff] }
  0x39   : > { %344 = vmatpush.bf16.msra.mxu0 %v930_v13  ;;  %501 = vmatpush.bf16.msra.mxu2 %v947_v39 }
  0x3a   : > { %423 = vmatpush.bf16.msra.mxu1 %v938_v14 }
  0x3d   : > { %345 = vmatpush.bf16.msra.mxu0 %v929_v15  ;;  %502 = vmatpush.bf16.msra.mxu2 %v946_v40 }
  0x3e   : > { %424 = vmatpush.bf16.msra.mxu1 %v937_v16 }
  0x41   : > { %346 = vmatpush.bf16.msra.mxu0 %v928_v17  ;;  %503 = vmatpush.bf16.msra.mxu2 %v945_v42 }
  0x42   : > { %425 = vmatpush.bf16.msra.mxu1 %v936_v18 }
  0x44   : > { %347 = vmatmul.bf16.vlgmr.msra.gmra.mxu0 %v927_v19 }
  0x45   : > { %426 = vmatmul.bf16.vlgmr.msra.gmra.mxu1 %v927_v19  ;;  %504 = vmatpush.bf16.msra.mxu2 %v944_v44 }
  0x48   : > { %505 = vmatmul.bf16.vlgmr.msra.gmra.mxu2 %v927_v19 }
  0xc1   : > { %v348_v20 = vpop.f32.mrf.mxu0 }
  0xc2   : > { %v427_v21 = vpop.f32.mrf.mxu1  ;;  %v511_v28 = vpack.c.bf16 %v348_v20, %v348_v20 }
  0xc3   : > { %v513_v22 = vpack.c.bf16 %v427_v21, %v427_v21 }
  0xc4   : > { %v519_v32 = vunpack.c.l.b16 %v511_v28 }
  0xc5   : > { %v524_v26 = vunpack.c.l.b16 %v513_v22 }
  0xc9   : > { %v350_v25 = vpop.f32.mrf.mxu0 }
  0xca   : > { %v429_v23 = vpop.f32.mrf.mxu1  ;;  %v512_v29 = vpack.c.bf16 %v350_v25, %v350_v25 }
  0xcb   : > { %v514_v24 = vpack.c.bf16 %v429_v23, %v429_v23  ;;  %v506_v57 = vpop.f32.mrf.mxu2 }
  0xcc   : > { %v520_v33 = vunpack.c.l.b16 %v512_v29  ;;  %v515_v58 = vpack.c.bf16 %v506_v57, %v506_v57 }
  0xcd   : > { %v525_v27 = vunpack.c.l.b16 %v514_v24 }
  0xce   : > { %v521_v34 = vpack.c.b16 %v520_v33, %v519_v32  ;;  %v580_v60 = vunpack.c.l.b16 %v515_v58 }
  0xcf   : > { %v526_v30 = vpack.c.b16 %v525_v27, %v524_v26 }
  0xd1   : > { %v532_v31 = vsel %vm527_vm0, %v526_v30, 0 }
  0xd2   : > { %541 = vmatpush.bf16.xpose.msra.mxu3 %v532_v31 }
  0xd3   : > { %v508_v59 = vpop.f32.mrf.mxu2 }
  0xd4   : > { %v516_v61 = vpack.c.bf16 %v508_v59, %v508_v59 }
  0xd6   : > { %v581_v62 = vunpack.c.l.b16 %v516_v61 }
  0xd8   : > { %v582_v63 = vpack.c.b16 %v581_v62, %v580_v60 }
  0xd9   : > { %908 = vmatmul.msk.bf16.vlgmr.msra.gmra.mxu3 %vm527_vm0, %v521_v34 }
  0xda   : > { %594 = vmatpush.bf16.msrb.mxu3 %v582_v63 }
  0xde   : > { %627 = vmatpush.bf16.msra.mxu3 %v953_v0 }
  0xe2   : > { %628 = vmatpush.bf16.msra.mxu3 %v952_v12 }
 0x15c   : > { %v543_v41 = vpop.f32.mrf.mxu3 }
 0x15d   : > { %v549_v43 = vsel %vm548_vm1, %v543_v41, -inf }
 0x15e   : > { %550 = vmax.xlane.f32.xlu0 %v549_v43 }
 0x164   : > { %v545_v45 = vpop.f32.mrf.mxu3 }
 0x165   : > { %v552_v46 = vsel %vm548_vm1, %v545_v45, -inf }
 0x166   : > { %553 = vmax.xlane.f32.xlu0 %v552_v46 }
 0x1d1   : > { %v551_v47 = vpop.xlane.xlu0 %550 }
 0x1d2   : > { %v555_v48 = vsub.f32 %v543_v41, %v551_v47 }
 0x1d4   : > { %v557_v49 = vmul.f32 1.442695, %v555_v48 }
 0x1d6   : > { %1033 = vpow2.f32 %v557_v49 }
 0x1d9   : > { %v554_v50 = vpop.xlane.xlu0 %553 }
 0x1da   : > { %v556_v51 = vsub.f32 %v545_v45, %v554_v50 }
 0x1dc   : > { %v1034_v52 = vpop.eup %1033  ;;  %v559_v53 = vmul.f32 1.442695, %v556_v51 }
 0x1dd   : > { %v561_v54 = vsel %vm548_vm1, %v1034_v52, 0.0 }
 0x1de   : > { %1035 = vpow2.f32 %v559_v53  ;;  %562 = vadd.xlane.f32.xlu1 %v561_v54 }
 0x1e4   : > { %v1036_v55 = vpop.eup %1035 }
 0x1e5   : > { %v564_v56 = vsel %vm548_vm1, %v1036_v55, 0.0 }
 0x1e6   : > { %565 = vadd.xlane.f32.xlu1 %v564_v56 }
 0x251   : > { %v563_v1 = vpop.xlane.xlu1 %562 }
 0x252   : > { %1037 = vrcp.f32 %v563_v1 }
 0x258   : > { %v1038_v3 = vpop.eup %1037 }
 0x259   : > { %v566_v2 = vpop.xlane.xlu1 %565  ;;  %v569_v4 = vmul.f32 %v1038_v3, %v1034_v52 }
 0x25a   : > { %1039 = vrcp.f32 %v566_v2 }
 0x25b   : > { %v571_v6 = vpack.c.bf16 %v569_v4, %v569_v4 }
 0x25d   : > { %v575_v9 = vunpack.c.l.b16 %v571_v6 }
 0x260   : > { %v1040_v5 = vpop.eup %1039 }
 0x261   : > { %v570_v7 = vmul.f32 %v1040_v5, %v1036_v55 }
 0x263   : > { %v572_v8 = vpack.c.bf16 %v570_v7, %v570_v7 }
 0x265   : > { %v576_v10 = vunpack.c.l.b16 %v572_v8 }
 0x267   : > { %v577_v11 = vpack.c.b16 %v576_v10, %v575_v9 }
 0x269   : > { %909 = vmatmul.msk.bf16.vlgmr.msrb.gmra.mxu3 %vm548_vm1, %v577_v11 }
 0x2ec   : > { %v596_v13 = vpop.f32.mrf.mxu3 }
 0x2f4   : > { %v598_v14 = vpop.f32.mrf.mxu3 }
 0x2f5   : > { %v601_v15 = vpack.c.bf16 %v598_v14, %v596_v13 }
 0x2f7   : > { %918 = vmatmul.msk.bf16.vlgmr.msra.gmra.mxu3 %vm527_vm0, %v601_v15 }
 0x37a   : > { %v630_v16 = vpop.f32.mrf.mxu3 }
 0x37e   : > { %637 = sbr.rel (%p775_p1) target bundleno = 902 (0x386), region = 44 }
 0x382   : > { %v632_v17 = vpop.f32.mrf.mxu3 }
 0x383   : > { %v1041_v18 = vld [vmem:[%s1352_s3] ss:$0 sm:$0xff] }
 0x384   : > { %642 = vst [vmem:[%s1254_s20] sm:$0xff] %v1041_v18 }
 0x385   : > { %643 = vst [vmem:[%s1254_s20 + $0x8] sm:$0xff] %v1041_v18 }
 0x386 PF: > { %s954_s18 = sshll.u32 %s1124_s19, 4  ;;  %s663_s8 = sshll.u32 %s1254_s20, 4  ;;  %s664_s8 = int_to_ptr.vmem [resolvable:$true] %s663_s8 }
 0x387   : > { %s662_s7 = scalar_lea.hbm %s1353_s4, %s954_s18  ;;  %s1364_s10 = sand.u32 1, %s1112_s16  }
 0x388   : > { %s665_s9 = sshll.u32 %s662_s7, 4  ;;  %s651_s11 = scalar_lea.sflag [#allocation4], %s1364_s10  ;;  %s666_s9 = int_to_ptr.hbm [resolvable:$true] %s665_s9 }
 0x389   : > { %s1056_s12 = sshra.s32 %s666_s9, 4  ;;  %s1062_s23 = scalar_lea.hbm %s1353_s4, 32  ;;  %s1057_s12 = int_to_ptr.hbm [resolvable:$true] %s1056_s12 }
 0x38a   : > { %s1058_s13 = scalar_lea.hbm %s1057_s12, 16  ;;  %p1063_p6 = scmp.lt.s32.totalorder %s1057_s12, %s1353_s4 }
 0x38b   : > { %v644_v19 = vld [vmem:[%s1254_s20] sm:$0xff]  ;;  %p1059_p2 = scmp.ne.s32.totalorder %s1057_s12, %s1058_s13  ;;  %p1064_p7 = scmp.lt.s32.totalorder %s1062_s23, %s1058_s13 }
 0x38c   : > { %v645_v20 = vld [vmem:[%s1254_s20 + $0x8] sm:$0xff]  ;;  %v646_v21 = vadd.f32 %v644_v19, %v630_v16 }
 0x38d   : > { %v647_v22 = vadd.f32 %v645_v20, %v632_v17  ;;  %p1060_p4 = pnand %p1059_p2, %p1214_p3  ;;  %p1065_p8 = por %p1064_p7, %p1063_p6 }
 0x38e   : > { %648 = vst [vmem:[%s1254_s20] sm:$0xff] %v646_v21 }
 0x38f   : > { %649 = vst [vmem:[%s1254_s20 + $0x8] sm:$0xff] %v647_v22  ;;  %p1061_p5 = pneg %p1060_p4 }
 0x391   : > { %p1066_p10 = pnand %p1065_p8, %p1061_p5 }
 0x393   : > { %1069 = shalt.err (!%p1066_p10)
}
 0x394   : > { %s1138_s20 = smov 128   ;;  %s1139_s30 = smov 8  }
 0x395   : > { %960 = dma.vmem_to_hbm [thread:$0]  (%p1214_p3), %s664_s8, 256, %s666_s9, %s651_s11, %s1138_s20, %s1138_s20, %s1139_s30  }
 0x396 PF: > { %p966_p11 = scmp.ge.s32.totalorder %s1136_s22, 2  ;;  %s680_s25 = sand.u32 1, %s1108_s15  }
 0x397   : > { %s681_s26 = scalar_lea.sflag [#allocation4], %s680_s25 }
 0x398   : > { %p963_p12 = pnand %p966_p11, %p1224_p9 }
 0x39a   : > { %p964_p13 = pneg %p963_p12 }
 0x39c   : > { %1103 = dma.done.wait (%p964_p13), %s681_s26, 256  }
 0x39d   : > { %1105 = vsyncadd (%p964_p13), %s681_s26, 4294967040  ;;  %s17_s22 = sadd.s32 1, %s1136_s22   ;;  %s1365_s18 = sld [smem:[#allocation6_spill]] }
 0x39e   : > { %p14_p0 = scmp.ge.s32.totalorder %s17_s22, 10   ;;  %s1366_s19 = sld [smem:[#allocation7_spill]] }
 0x39f   : > { %s1367_s20 = sld [smem:[#allocation8_spill]]  ;;  %s1369_s15 = smov %s1112_s16 }
 0x3a0   : > { %s1368_s21 = sld [smem:[#allocation9_spill]]  ;;  %s1370_s16 = smov %s1116_s17 }
 0x3a1   : > { %s1371_s17 = smov %s1232_s5  ;;  %16 = sbr.rel (!%p14_p0) target bundleno = 5 (0x5), region = 87 }
 0x3a6   :  { %687 = vsyncpa [#allocation4], 1 }
 0x3a7   :  { %689 = vsyncpa [#allocation4 + $0x1], 1 }

</bundles_post_ra>
